<compile_context>
chip_gen: v7x
topology: tpu7x:2x2x1
jax: 0.10.0
libtpu: 0.0.40
codegen_flags: <defaults>
</compile_context>

<pallas_src>
import jax
import jax.numpy as jnp
from jax.experimental import pallas as pl
from jax.experimental.pallas import tpu as pltpu

NEGATIVE_SLOPE = 0.25

_LANE = 128
_MIB = 1024 * 1024


def _leaky_relu_kernel(x_ref, o_ref):
    x = x_ref[...]
    o_ref[...] = jnp.where(x >= 0, x, x * NEGATIVE_SLOPE)


def _chip_config():
    """Per-generation (target_block_bytes, vmem_limit_bytes, multi_core).

    Decided from the chip's VMEM capacity:
      * <= 64 MiB  -> v7x-class: 2 TCs/chip, ~3.2 TB/s per TC. Big blocks
                      (6 MiB) to hide per-step overhead, 40 MiB scoped VMEM
                      (physical 64 MiB), core-parallel grid sharding.
      * otherwise  -> v5e/v6e-class (128 MiB VMEM, 1 TC): 4 MiB blocks,
                      32 MiB scoped VMEM (safe on both; v5e default is 16).
    Falls back to conservative settings if the query is unavailable.
    """
    try:
        info = pltpu.get_tpu_info()
        vmem = getattr(info, "vmem_capacity_bytes", None)
    except Exception:
        vmem = None
    if vmem is None:
        return 2 * _MIB, None, False
    if vmem <= 64 * _MIB:
        return 6 * _MIB, 40 * _MIB, True
    return 4 * _MIB, 32 * _MIB, False


def _pick_layout(n, itemsize, target_block_bytes):
    """Choose (rows, cols, block_rows) for a flat array of n elements.

    cols is the widest power-of-two multiple of 128 (<= 8192) dividing n, so
    every block is lane-dense and each block DMA is a contiguous HBM chunk.
    block_rows is a multiple of 32 sublanes (valid for f32/bf16/int8/fp8),
    sized so one block is ~target_block_bytes.  Returns None if n is not a
    multiple of 128.
    """
    cols = None
    for c in (8192, 4096, 2048, 1024, 512, 256, 128):
        if n % c == 0:
            cols = c
            break
    if cols is None:
        return None
    rows = n // cols
    target_rows = max(1, target_block_bytes // (itemsize * cols))
    if rows <= target_rows:
        block_rows = rows  # single row-block == full array dim (always legal)
    else:
        block_rows = min(rows, max(32, (target_rows // 32) * 32))
    return rows, cols, block_rows


def _leaky_relu_2d(x2d, block_rows, *, vmem_limit_bytes, multi_core, donate):
    rows, cols = x2d.shape
    grid = (pl.cdiv(rows, block_rows),)

    # Explicit cross-core sharding only where it changes codegen (v7x, 2 TCs)
    # and there is more than one tile to split.
    if multi_core and grid[0] >= 2:
        dim_sem = (pltpu.CORE_PARALLEL,)
    else:
        dim_sem = ("parallel",)

    cp_kwargs = dict(dimension_semantics=dim_sem)
    if vmem_limit_bytes is not None:
        cp_kwargs["vmem_limit_bytes"] = vmem_limit_bytes

    call_kwargs = {}
    if donate:
        # Halves HBM footprint; only safe if the caller donates the input.
        call_kwargs["input_output_aliases"] = {0: 0}

    return pl.pallas_call(
        _leaky_relu_kernel,
        out_shape=jax.ShapeDtypeStruct((rows, cols), x2d.dtype),
        grid=grid,
        in_specs=[pl.BlockSpec((block_rows, cols), lambda i: (i, 0))],
        out_specs=pl.BlockSpec((block_rows, cols), lambda i: (i, 0)),
        compiler_params=pltpu.CompilerParams(**cp_kwargs),
        **call_kwargs,
    )(x2d)


def leaky_relu(x, donate=False):
    """LeakyReLU(negative_slope=0.25) for an arbitrary-shaped array."""
    orig_shape = x.shape
    n = x.size
    if n == 0:
        return x

    block_bytes, vmem_limit, multi_core = _chip_config()
    flat = jnp.reshape(x, (-1,))  # bitcast, no copy
    layout = _pick_layout(n, x.dtype.itemsize, block_bytes)

    if layout is None:
        # Rare ragged case: run the kernel on the 128-aligned prefix, the
        # (<128 element) tail with plain jnp.where.  No full-array pad/slice.
        n_aligned = (n // _LANE) * _LANE
        if n_aligned == 0:
            return jnp.where(x >= 0, x, x * NEGATIVE_SLOPE)
        head, tail = flat[:n_aligned], flat[n_aligned:]
        rows, cols, block_rows = _pick_layout(
            n_aligned, x.dtype.itemsize, block_bytes)
        head_out = _leaky_relu_2d(
            jnp.reshape(head, (rows, cols)), block_rows,
            vmem_limit_bytes=vmem_limit, multi_core=multi_core, donate=False)
        tail_out = jnp.where(tail >= 0, tail, tail * NEGATIVE_SLOPE)
        return jnp.reshape(
            jnp.concatenate([jnp.reshape(head_out, (-1,)), tail_out]),
            orig_shape)

    rows, cols, block_rows = layout
    out2d = _leaky_relu_2d(
        jnp.reshape(flat, (rows, cols)), block_rows,
        vmem_limit_bytes=vmem_limit, multi_core=multi_core, donate=donate)
    return jnp.reshape(out2d, orig_shape)


if __name__ == "__main__":
    key = jax.random.PRNGKey(0)

    # NCHW, as the PyTorch module would see it.
    x = jax.random.normal(key, (2, 4, 16, 16), dtype=jnp.float32)
    y = jax.block_until_ready(leaky_relu(x))
    y_ref = jnp.where(x >= 0, x, x * NEGATIVE_SLOPE)
    assert y.shape == x.shape and y.dtype == x.dtype
    assert jnp.allclose(y, y_ref, atol=0, rtol=0)

    # Exercise the ragged (size % 128 != 0) path as well.
    x2 = jax.random.normal(jax.random.PRNGKey(1), (5, 131), dtype=jnp.float32)
    y2 = jax.block_until_ready(leaky_relu(x2))
    y2_ref = jnp.where(x2 >= 0, x2, x2 * NEGATIVE_SLOPE)
    assert y2.shape == x2.shape and jnp.allclose(y2, y2_ref, atol=0, rtol=0)

    print("KERNEL_OK")
</pallas_src>

<mosaic_0001>
module attributes {stable_mosaic.version = 11 : i64} {
  func.func @_leaky_relu_kernel(%arg0: i32, %arg1: memref<1x2048xf32, #tpu.memory_space<vmem>>, %arg2: memref<1x2048xf32, #tpu.memory_space<vmem>>) attributes {dimension_semantics = [#tpu.dimension_semantics<parallel>], iteration_bounds = array<i64: 1>, scalar_prefetch = 0 : i64, scratch_operands = 0 : i64, tpu.core_type = #tpu.core_type<tc>, window_params = [{transform_indices = @transform_0, window_bounds = array<i64: 1, 2048>}, {transform_indices = @transform_1, window_bounds = array<i64: 1, 2048>}]} {
    %c0 = arith.constant 0 : index
    %c0_0 = arith.constant 0 : index
    %0 = vector.load %arg1[%c0, %c0_0] : memref<1x2048xf32, #tpu.memory_space<vmem>>, vector<1x2048xf32>
    %cst = arith.constant 0.000000e+00 : f32
    %1 = vector.broadcast %cst : f32 to vector<1x2048xf32>
    %2 = arith.cmpf oge, %0, %1 : vector<1x2048xf32>
    %cst_1 = arith.constant 2.500000e-01 : f32
    %3 = vector.broadcast %cst_1 : f32 to vector<1x2048xf32>
    %4 = arith.mulf %0, %3 : vector<1x2048xf32>
    %5 = arith.select %2, %0, %4 : vector<1x2048xi1>, vector<1x2048xf32>
    %c0_2 = arith.constant 0 : index
    %c0_3 = arith.constant 0 : index
    %6 = vector.load %arg2[%c0_2, %c0_3] : memref<1x2048xf32, #tpu.memory_space<vmem>>, vector<1x2048xf32>
    tpu.vector_store %arg2[%c0_2, %c0_3], %5 {strides = array<i32>} : memref<1x2048xf32, #tpu.memory_space<vmem>>, vector<1x2048xf32>,
    return
  }
  func.func @transform_0(%arg0: i32) -> (i32, i32) {
    %c0_i32 = arith.constant 0 : i32
    %c0_i32_0 = arith.constant 0 : i32
    return %arg0, %c0_i32 : i32, i32
  }
  func.func @transform_1(%arg0: i32) -> (i32, i32) {
    %c0_i32 = arith.constant 0 : i32
    %c0_i32_0 = arith.constant 0 : i32
    return %arg0, %c0_i32 : i32, i32
  }
}

</mosaic_0001>

<bundles_post_ra>
// kernel: tpu_custom_call.1
= control target key start
LH: loop header
LB: loop body
LE: loop exit
PB: predicated region body
PF: predicated region fallthrough
CT: control target
= control target key end

     0   :  { %6 = vsyncpa [#allocation3], 0  ;;  %s132_s0 = inlined_call_operand.hbm [shape: f32[1,2048], index: 0, kind: input, shape index: {}]   ;;  %s133_s1 = inlined_call_operand.hbm [shape: f32[1,2048], index: 1, kind: output, shape index: {}]  }
   0x1   :  { %7 = vsyncpa [#allocation4], 0  ;;  %s96_s6 = smov [#allocation2]   ;;  %s48_s10 = scalar_lea.hbm %s132_s0, 256 }
   0x2   :  { %s14_s7 = sshll.u32 %s96_s6, 4  ;;  %p49_p0 = scmp.ne.s32.totalorder %s132_s0, %s48_s10  ;;  %s15_s7 = int_to_ptr.vmem [resolvable:$true] %s14_s7 }
   0x3   :  { %p52_p1 = scmp.lt.u32.totalorder %s48_s10, %s132_s0 }
   0x5   :  { %p54_p2 = pnand %p52_p1, %p49_p0 }
   0x7   :  { %57 = shalt.err (!%p54_p2)
}
   0x8   :  { %s58_s15 = scalar_lea.vmem %s15_s7, 256  ;;  %p63_p4 = scmp.lt.s32.totalorder %s15_s7, %s15_s7 }
   0x9   :  { %p59_p3 = scmp.ne.s32.totalorder %s15_s7, %s58_s15  ;;  %p64_p5 = scmp.lt.s32.totalorder %s58_s15, %s58_s15 }
   0xb   :  { %p65_p6 = por %p64_p5, %p63_p4 }
   0xd   :  { %p66_p7 = pnand %p65_p6, %p59_p3 }
   0xf   :  { %69 = shalt.err (!%p66_p7)
}
  0x10   :  { %17 = dma.hbm_to_vmem [thread:$0]  %s132_s0, 256, %s15_s7, [#allocation3]  }
  0x11   :  { %92 = dma.done.wait [#allocation3], 256  }
  0x12   :  { %93 = vsyncadd [#allocation3], 4294967040  ;;  %s97_s18 = smov [#allocation5]   ;;  %v21_v0 = vld [vmem:[#allocation2] sm:$0xff]  ;;  %v22_v1 = vld [vmem:[#allocation2 + $0x8] sm:$0xff] }
  0x13   :  { %s37_s19 = sshll.u32 %s97_s18, 4  ;;  %vm23_vm0 = vcmp.ge.f32.partialorder %v21_v0, 0.0  ;;  %v25_v2 = vmul.f32 0.25, %v21_v0  ;;  %vm24_vm1 = vcmp.ge.f32.partialorder %v22_v1, 0.0  ;;  %v26_v3 = vmul.f32 0.25, %v22_v1  ;;  %s38_s19 = int_to_ptr.vmem [resolvable:$true] %s37_s19 }
  0x14   :  { %s70_s20 = scalar_lea.vmem %s38_s19, 256  ;;  %p75_p9 = scmp.lt.s32.totalorder %s38_s19, %s38_s19 }
  0x15   :  { %v27_v4 = vsel %vm23_vm0, %v21_v0, %v25_v2  ;;  %v28_v5 = vsel %vm24_vm1, %v22_v1, %v26_v3  ;;  %p71_p8 = scmp.ne.s32.totalorder %s38_s19, %s70_s20  ;;  %p76_p10 = scmp.lt.s32.totalorder %s70_s20, %s70_s20 }
  0x16   :  { %29 = vst [vmem:[#allocation5] sm:$0xff] %v27_v4  ;;  %30 = vst [vmem:[#allocation5 + $0x8] sm:$0xff] %v28_v5 }
  0x17   :  { %p77_p11 = por %p76_p10, %p75_p9 }
  0x19   :  { %p78_p12 = pnand %p77_p11, %p71_p8 }
  0x1b   :  { %81 = shalt.err (!%p78_p12)
}
  0x1c   :  { %s82_s22 = scalar_lea.hbm %s133_s1, 256 }
  0x1d   :  { %p83_p13 = scmp.ne.s32.totalorder %s133_s1, %s82_s22  ;;  %p86_p0 = scmp.lt.u32.totalorder %s82_s22, %s133_s1 }
  0x1f   :  { %p88_p1 = pnand %p86_p0, %p83_p13 }
  0x21   :  { %91 = shalt.err (!%p88_p1)
}
  0x22   :  { %40 = dma.vmem_to_hbm [thread:$0]  %s38_s19, 256, %s133_s1, [#allocation4]  }
  0x23   :  { %94 = dma.done.wait [#allocation4], 256  }
  0x24   :  { %95 = vsyncadd [#allocation4], 4294967040 }
  0x25   :  { %44 = vsyncpa [#allocation3], 1 }
  0x26   :  { %45 = vsyncpa [#allocation4], 1 }

</bundles_post_ra>
